<compile_context>
chip_gen: v5e
topology: v5e:2x2
jax: 0.10.0
libtpu: 0.0.40
codegen_flags: <defaults>
</compile_context>

<pallas_src>
import functools

import jax
import jax.numpy as jnp
from jax.experimental import pallas as pl
from jax.experimental.pallas import tpu as pltpu

_EPS2 = 1e-24  # (torch F.normalize eps = 1e-12) squared


# ---------------------------------------------------------------------------
# Small helpers
# ---------------------------------------------------------------------------
def _round_up(x, m):
    return ((int(x) + m - 1) // m) * m


def _lane(x):
    return _round_up(max(int(x), 1), 128)


def _sub(x, m=8):
    return _round_up(max(int(x), 1), m)


def _l2_normalize_rows(x):
    # x / max(||x||_2, eps)  ==  x * rsqrt(max(sum(x^2), eps^2))
    ss = jnp.sum(x * x, axis=-1, keepdims=True)
    return x * jax.lax.rsqrt(jnp.maximum(ss, _EPS2))


def _signed_power(s, p_factor):
    """sign(s) * |s|**p.  Integer p -> repeated VPU multiplies (no EUP pow,
    and no compare+select sign() on the even-power path)."""
    p_int = int(round(p_factor))
    if abs(p_factor - p_int) < 1e-12 and 1 <= p_int <= 8:
        if p_int == 1:
            return s
        s2 = s * s
        if p_int % 2 == 0:
            a = s * jnp.abs(s)                 # sign(s) * |s|^2
            for _ in range((p_int - 2) // 2):
                a = a * s2
            return a
        a = s                                  # odd power: plain s^p
        for _ in range((p_int - 1) // 2):
            a = a * s2
        return a
    # Non-integer p: exact (exp/log based) path on the EUP.
    return jnp.sign(s) * jnp.power(jnp.abs(s), p_factor)


def _pick_tile(dim, cap, mult):
    """Largest tile <= cap dividing dim, preferring multiples of `mult`;
    falls back to any divisor, then to the whole dim."""
    dim, cap = int(dim), int(cap)
    if dim <= cap:
        return dim
    best = None
    for t in range(min(cap, dim), 0, -1):
        if dim % t == 0:
            if t % mult == 0:
                return t
            if best is None:
                best = t
    return best if best is not None else dim


def _vmem_capacity_bytes(default=64 * 1024 * 1024):
    """Per-core VMEM capacity (v5e/v6e: 128 MiB, v7x: 64 MiB). Conservative
    fallback if the query is unavailable."""
    try:
        info = pltpu.get_tpu_info()
    except Exception:
        return default
    for name in ("vmem_capacity_bytes", "vmem_size_bytes", "vmem_bytes"):
        cap = getattr(info, name, None)
        if cap:
            return int(cap)
    return default


# ---------------------------------------------------------------------------
# Stage 1a: query-independent exemplar precompute.
#   - project exemplars through g, L2-normalize, emit TRANSPOSED (F, N) bf16
#   - fold ex_classes @ class_reps (already C-padded) into (N, C_pad) bf16
# ---------------------------------------------------------------------------
def _exemplar_kernel(exfeat_ref, wg_ref, bg_ref, exclass_ref, creps_ref,
                     efn_t_ref, excr_ref):
    ef = jnp.dot(exfeat_ref[...], wg_ref[...],
                 preferred_element_type=jnp.float32) + bg_ref[...]     # (tn, F)
    efn = _l2_normalize_rows(ef)
    efn_t_ref[...] = efn.T.astype(efn_t_ref.dtype)                     # (F, tn)
    excr_ref[...] = jnp.dot(exclass_ref[...], creps_ref[...],
                            preferred_element_type=jnp.float32
                            ).astype(excr_ref.dtype)                   # (tn, C_pad)


def _exemplar_vmem_bytes(tn, D, F, L, C_pad, feed_bytes):
    return (2 * tn * _lane(D) * 4                 # ex_features tile (double-buffered)
            + 2 * _sub(D) * _lane(F) * 4          # W_g^T
            + 2 * 8 * _lane(F) * 4                # b_g
            + 2 * tn * _lane(L) * 4               # ex_classes tile
            + 2 * _sub(L) * C_pad * 4             # class_reps (C-padded)
            + 2 * _sub(F, 16) * tn * feed_bytes   # efn^T out
            + 2 * tn * C_pad * feed_bytes         # excr out
            + 4 * tn * _lane(F) * 4)              # projection temporaries


def exemplar_precompute(ex_features, w_g_t, b_g, ex_classes, class_reps_cpad,
                        feed_dtype, vmem_budget, tn_cap):
    N, D = ex_features.shape
    F = w_g_t.shape[1]
    L, C_pad = class_reps_cpad.shape
    feed_bytes = jnp.dtype(feed_dtype).itemsize

    # Keep >= 2 grid steps when possible (shards across TCs on v7x), and
    # shrink if the VMEM estimate overshoots the per-generation budget.
    tn = _pick_tile(N, min(tn_cap, max(128, N // 2)), 128)
    while _exemplar_vmem_bytes(tn, D, F, L, C_pad, feed_bytes) > vmem_budget and tn > 128:
        nt = _pick_tile(N, tn // 2, 128)
        if nt >= tn:
            break
        tn = nt

    grid = (N // tn,)
    efn_t, excr = pl.pallas_call(
        _exemplar_kernel,
        out_shape=(jax.ShapeDtypeStruct((F, N), feed_dtype),
                   jax.ShapeDtypeStruct((N, C_pad), feed_dtype)),
        grid_spec=pltpu.PrefetchScalarGridSpec(
            num_scalar_prefetch=0, grid=grid,
            in_specs=[pl.BlockSpec((tn, D), lambda k: (k, 0)),
                      pl.BlockSpec((D, F), lambda k: (0, 0)),
                      pl.BlockSpec((1, F), lambda k: (0, 0)),
                      pl.BlockSpec((tn, L), lambda k: (k, 0)),
                      pl.BlockSpec((L, C_pad), lambda k: (0, 0))],
            out_specs=(pl.BlockSpec((F, tn), lambda k: (0, k)),
                       pl.BlockSpec((tn, C_pad), lambda k: (k, 0)))),
        compiler_params=pltpu.CompilerParams(
            dimension_semantics=("parallel",),
            vmem_limit_bytes=int(vmem_budget)),
    )(ex_features.astype(jnp.float32),
      w_g_t.astype(jnp.float32),
      b_g.reshape(1, -1).astype(jnp.float32),
      ex_classes.astype(jnp.float32),
      class_reps_cpad.astype(jnp.float32))
    return efn_t, excr


# ---------------------------------------------------------------------------
# Stage 1b: query projection + L2-normalize, hoisted out of the hot kernel.
# ---------------------------------------------------------------------------
def _query_proj_kernel(feat_ref, wg_ref, bg_ref, fn_ref):
    f = jnp.dot(feat_ref[...], wg_ref[...],
                preferred_element_type=jnp.float32) + bg_ref[...]      # (tb, F)
    fn_ref[...] = _l2_normalize_rows(f).astype(fn_ref.dtype)


def query_project(features, w_g_t, b_g, feed_dtype, vmem_budget):
    B, D = features.shape
    F = w_g_t.shape[1]
    tb = _pick_tile(B, min(256, max(8, B // 2)), 8)
    grid = (B // tb,)
    return pl.pallas_call(
        _query_proj_kernel,
        out_shape=jax.ShapeDtypeStruct((B, F), feed_dtype),
        grid_spec=pltpu.PrefetchScalarGridSpec(
            num_scalar_prefetch=0, grid=grid,
            in_specs=[pl.BlockSpec((tb, D), lambda i: (i, 0)),
                      pl.BlockSpec((D, F), lambda i: (0, 0)),
                      pl.BlockSpec((1, F), lambda i: (0, 0))],
            out_specs=pl.BlockSpec((tb, F), lambda i: (i, 0))),
        compiler_params=pltpu.CompilerParams(
            dimension_semantics=("parallel",),
            vmem_limit_bytes=int(vmem_budget)),
    )(features.astype(jnp.float32),
      w_g_t.astype(jnp.float32),
      b_g.reshape(1, -1).astype(jnp.float32))


# ---------------------------------------------------------------------------
# Stage 2: hot-path kernel  (grid = (B tiles [parallel], N tiles [arbitrary])).
# ---------------------------------------------------------------------------
def _minerva_kernel(p_factor,
                    fn_ref, efn_t_ref, excr_ref, cr_t_ref, c2_ref,
                    mult_ref, thresh_ref,
                    logits_ref, echo_ref,
                    acc_sc):
    k = pl.program_id(1)

    @pl.when(k == 0)
    def _():
        acc_sc[...] = jnp.zeros_like(acc_sc)

    # (tb, F) bf16 x (F, tn) bf16 -> f32 similarity (native bf16 MXU path).
    s = jnp.dot(fn_ref[...], efn_t_ref[...],
                preferred_element_type=jnp.float32)                    # (tb, tn)
    a = _signed_power(s, p_factor).astype(excr_ref.dtype)              # bf16
    acc_sc[...] += jnp.dot(a, excr_ref[...],
                           preferred_element_type=jnp.float32)         # (tb, C_pad)

    @pl.when(k == pl.num_programs(1) - 1)
    def _():
        echo = acc_sc[...]
        # logits = -cdist(echo, class_reps) * mult - thresh (expanded form;
        # padded class columns/rows are all-zero so they contribute nothing).
        e2 = jnp.sum(echo * echo, axis=-1, keepdims=True)              # (tb, 1)
        ec = jnp.dot(echo, cr_t_ref[...],
                     preferred_element_type=jnp.float32)               # (tb, L_pad)
        dist = jnp.sqrt(jnp.maximum(e2 + c2_ref[...] - 2.0 * ec, 0.0))
        logits_ref[...] = (-dist) * mult_ref[...] - thresh_ref[...]
        echo_ref[...] = echo


def minerva_thresh_forward(features, ex_features, w_g_t, b_g,
                           ex_classes, class_reps, mult, thresh,
                           p_factor=3.0, tb_cap=None, tn_cap=None,
                           feed_dtype=jnp.bfloat16):
    features = jnp.asarray(features, jnp.float32)
    ex_features = jnp.asarray(ex_features, jnp.float32)
    w_g_t = jnp.asarray(w_g_t, jnp.float32)
    b_g = jnp.asarray(b_g, jnp.float32)
    ex_classes = jnp.asarray(ex_classes, jnp.float32)
    class_reps = jnp.asarray(class_reps, jnp.float32)
    feed_bytes = jnp.dtype(feed_dtype).itemsize

    B, D = features.shape
    F = w_g_t.shape[1]
    N = ex_features.shape[0]
    L, C = class_reps.shape

    # Lane-pad the tiny class dims (C = L = num_labels) so the second matmul
    # RHS, the echo accumulator and the final stores are full-lane.
    C_pad = _lane(C)
    L_pad = _lane(L)
    class_reps_cpad = jnp.pad(class_reps, ((0, 0), (0, C_pad - C)))    # (L, C_pad)
    cr_t = jnp.pad(class_reps_cpad.T, ((0, 0), (0, L_pad - L)))        # (C_pad, L_pad)
    c2 = jnp.pad(jnp.sum(class_reps * class_reps, axis=-1),
                 (0, L_pad - L)).reshape(1, L_pad)
    mult_p = jnp.pad(jnp.asarray(mult, jnp.float32).reshape(-1),
                     (0, L_pad - L)).reshape(1, L_pad)
    thresh_p = jnp.pad(jnp.asarray(thresh, jnp.float32).reshape(-1),
                       (0, L_pad - L)).reshape(1, L_pad)

    # Per-generation VMEM budget / tile caps (v5e/v6e 128 MiB vs v7x 64 MiB).
    capacity = _vmem_capacity_bytes()
    budget = max(16 * 1024 * 1024, int(0.7 * capacity))
    if tn_cap is None:
        tn_cap = 8192 if capacity >= 96 * 1024 * 1024 else 4096
    if tb_cap is None:
        tb_cap = 512 if capacity >= 96 * 1024 * 1024 else 256

    # Stage 1: all query-independent work + query projection hoisted out of
    # the hot path; exemplar data is emitted in bf16, pre-transposed.
    efn_t, ex_class_reps = exemplar_precompute(
        ex_features, w_g_t, b_g, ex_classes, class_reps_cpad,
        feed_dtype, budget, tn_cap)
    fn = query_project(features, w_g_t, b_g, feed_dtype, budget)

    # Hot-path tiles: keep >= 2 B tiles / N tiles when possible (megacore),
    # then shrink tn/tb if the VMEM estimate overshoots the budget.
    tb = _pick_tile(B, min(tb_cap, max(8, B // 2)), 8)
    tn = _pick_tile(N, min(tn_cap, max(128, N // 2)), 128)

    def _stage2_vmem(tb_, tn_):
        return (2 * tb_ * _lane(F) * feed_bytes          # fn block
                + 2 * _sub(F, 16) * tn_ * feed_bytes     # efn^T stream
                + 2 * tn_ * C_pad * feed_bytes           # ex_class_reps stream
                + 2 * C_pad * L_pad * 4                  # class_reps^T
                + 6 * 8 * L_pad * 4                      # c2 / mult / thresh
                + 2 * tb_ * (L_pad + C_pad) * 4          # outputs
                + tb_ * C_pad * 4                        # echo accumulator
                + 3 * tb_ * tn_ * 4)                     # s / a temporaries

    while _stage2_vmem(tb, tn) > budget and tn > 128:
        nt = _pick_tile(N, tn // 2, 128)
        if nt >= tn:
            break
        tn = nt
    while _stage2_vmem(tb, tn) > budget and tb > 8:
        nb = _pick_tile(B, tb // 2, 8)
        if nb >= tb:
            break
        tb = nb

    grid = (B // tb, N // tn)
    n_btiles = grid[0]

    flops = (2 * B * N * F + 2 * B * N * C_pad + 6 * B * N
             + 2 * B * C_pad * L_pad)
    # Exemplar tensors are re-streamed from HBM once per B tile.
    bytes_accessed = (n_btiles * N * (F + C_pad) * feed_bytes
                      + B * F * feed_bytes
                      + B * (L_pad + C_pad) * 4
                      + (C_pad * L_pad + 3 * L_pad) * 4)
    cost = pl.CostEstimate(flops=int(flops), transcendentals=int(B * L_pad),
                           bytes_accessed=int(bytes_accessed))

    logits_p, echo_p = pl.pallas_call(
        functools.partial(_minerva_kernel, float(p_factor)),
        out_shape=(jax.ShapeDtypeStruct((B, L_pad), jnp.float32),
                   jax.ShapeDtypeStruct((B, C_pad), jnp.float32)),
        grid_spec=pltpu.PrefetchScalarGridSpec(
            num_scalar_prefetch=0, grid=grid,
            in_specs=[pl.BlockSpec((tb, F), lambda i, k: (i, 0)),        # fn (bf16)
                      pl.BlockSpec((F, tn), lambda i, k: (0, k)),        # efn^T (bf16)
                      pl.BlockSpec((tn, C_pad), lambda i, k: (k, 0)),    # ex_class_reps (bf16)
                      pl.BlockSpec((C_pad, L_pad), lambda i, k: (0, 0)), # class_reps^T
                      pl.BlockSpec((1, L_pad), lambda i, k: (0, 0)),     # ||class_reps||^2
                      pl.BlockSpec((1, L_pad), lambda i, k: (0, 0)),     # mult
                      pl.BlockSpec((1, L_pad), lambda i, k: (0, 0))],    # thresh
            out_specs=(pl.BlockSpec((tb, L_pad), lambda i, k: (i, 0)),
                       pl.BlockSpec((tb, C_pad), lambda i, k: (i, 0))),
            scratch_shapes=[pltpu.VMEM((tb, C_pad), jnp.float32)]),      # echo acc
        compiler_params=pltpu.CompilerParams(
            dimension_semantics=("parallel", "arbitrary"),
            vmem_limit_bytes=int(budget)),
        cost_estimate=cost,
    )(fn, efn_t, ex_class_reps, cr_t, c2, mult_p, thresh_p)

    logits = logits_p[:, :L]
    echo = echo_p[:, :C]
    loss = None  # labels=None eval path (BCEWithLogitsLoss skipped)
    return loss, logits, echo


if __name__ == "__main__":
    # Small shapes consistent with the module; chosen so the (B, N) grid has
    # multiple tiles (2 x 2) under the ">= 2 tiles per parallel axis" policy.
    B = 16           # batch of query features
    D_IN = 32        # args.input_dim
    F = 32           # args.feat_dim (g output)
    N_EX = 256       # number of exemplars
    L = 8            # args.num_labels == args.num_classes
    P_FACTOR = 3.0   # args.p_factor

    key = jax.random.PRNGKey(0)
    k_feat, k_exf, k_w, k_b, k_exc = jax.random.split(key, 5)

    features = jax.random.normal(k_feat, (B, D_IN), dtype=jnp.float32)
    ex_features = jax.random.normal(k_exf, (N_EX, D_IN), dtype=jnp.float32)

    # g = nn.Linear(D_IN, F): weight ~ U(-sqrt(k), sqrt(k)), k = 1/D_IN.
    bound = 1.0 / (D_IN ** 0.5)
    w_g_t = jax.random.uniform(k_w, (D_IN, F), minval=-bound, maxval=bound,
                               dtype=jnp.float32)        # stored transposed
    b_g = jax.random.uniform(k_b, (F,), minval=-bound, maxval=bound,
                             dtype=jnp.float32)

    ex_classes = jax.random.uniform(k_exc, (N_EX, L), dtype=jnp.float32)
    class_reps = jnp.eye(L, dtype=jnp.float32)            # class_dim=None -> one-hot

    mult = jnp.ones((L,), dtype=jnp.float32)              # nn.Parameter(torch.ones)
    thresh = jnp.zeros((L,), dtype=jnp.float32)           # nn.Parameter(torch.zeros)

    loss, logits, echo = minerva_thresh_forward(
        features, ex_features, w_g_t, b_g, ex_classes, class_reps,
        mult, thresh, p_factor=P_FACTOR)
    jax.block_until_ready((logits, echo))

    # Pure-JAX f32 reference of the same forward semantics.
    def ref_forward(features, ex_features, w_g_t, b_g, ex_classes, class_reps,
                    mult, thresh, p):
        def norm(x):
            n = jnp.sqrt(jnp.sum(x * x, axis=-1, keepdims=True))
            return x / jnp.maximum(n, 1e-12)
        f = features @ w_g_t + b_g
        ef = ex_features @ w_g_t + b_g
        s = norm(f) @ norm(ef).T
        a = jnp.sign(s) * jnp.abs(s) ** p
        echo = a @ (ex_classes @ class_reps)
        diff = echo[:, None, :] - class_reps[None, :, :]
        dist = jnp.sqrt(jnp.sum(diff * diff, axis=-1))
        return -dist * mult - thresh, echo

    ref_logits, ref_echo = ref_forward(features, ex_features, w_g_t, b_g,
                                       ex_classes, class_reps, mult, thresh,
                                       P_FACTOR)

    assert logits.shape == (B, L) and echo.shape == (B, L)
    assert loss is None
    # bf16 exemplar/query feeds (f32 accumulation) -> compare at bf16-level
    # tolerance against the pure-f32 reference.
    assert jnp.allclose(logits, ref_logits, atol=2e-2, rtol=2e-2)
    assert jnp.allclose(echo, ref_echo, atol=2e-2, rtol=2e-2)
    print("KERNEL_OK")
</pallas_src>

<mosaic_0001>
module attributes {stable_mosaic.version = 11 : i64} {
  func.func @_exemplar_kernel(%arg0: i32, %arg1: memref<128x32xf32, #tpu.memory_space<vmem>>, %arg2: memref<32x32xf32, #tpu.memory_space<vmem>>, %arg3: memref<1x32xf32, #tpu.memory_space<vmem>>, %arg4: memref<128x8xf32, #tpu.memory_space<vmem>>, %arg5: memref<8x128xf32, #tpu.memory_space<vmem>>, %arg6: memref<32x128xbf16, #tpu.memory_space<vmem>>, %arg7: memref<128x128xbf16, #tpu.memory_space<vmem>>) attributes {dimension_semantics = [#tpu.dimension_semantics<parallel>], iteration_bounds = array<i64: 2>, scalar_prefetch = 0 : i64, scratch_operands = 0 : i64, tpu.core_type = #tpu.core_type<tc>, window_params = [{transform_indices = @transform_0, window_bounds = array<i64: 128, 32>}, {pipeline_mode = #tpu.pipeline_mode<synchronous>, transform_indices = @transform_1, window_bounds = array<i64: 32, 32>}, {pipeline_mode = #tpu.pipeline_mode<synchronous>, transform_indices = @transform_2, window_bounds = array<i64: 1, 32>}, {transform_indices = @transform_3, window_bounds = array<i64: 128, 8>}, {pipeline_mode = #tpu.pipeline_mode<synchronous>, transform_indices = @transform_4, window_bounds = array<i64: 8, 128>}, {transform_indices = @transform_5, window_bounds = array<i64: 32, 128>}, {transform_indices = @transform_6, window_bounds = array<i64: 128, 128>}]} {
    %c0 = arith.constant 0 : index
    %c0_0 = arith.constant 0 : index
    %0 = vector.load %arg1[%c0, %c0_0] : memref<128x32xf32, #tpu.memory_space<vmem>>, vector<128x32xf32>
    %c0_1 = arith.constant 0 : index
    %c0_2 = arith.constant 0 : index
    %1 = vector.load %arg2[%c0_1, %c0_2] : memref<32x32xf32, #tpu.memory_space<vmem>>, vector<32x32xf32>
    %cst = arith.constant dense<0.000000e+00> : vector<128x32xf32>
    %2 = tpu.matmul %0, %1, %cst {dimension_numbers = #tpu.dot_dimension_numbers<[1], [0], [0], [1], [0, 0, 1, 1], [], []>} : vector<128x32xf32>, vector<32x32xf32>, vector<128x32xf32> -> vector<128x32xf32>
    %c0_3 = arith.constant 0 : index
    %c0_4 = arith.constant 0 : index
    %3 = vector.load %arg3[%c0_3, %c0_4] : memref<1x32xf32, #tpu.memory_space<vmem>>, vector<1x32xf32>
    %4 = vector.broadcast %3 : vector<1x32xf32> to vector<128x32xf32>
    %5 = arith.addf %2, %4 : vector<128x32xf32>
    %6 = arith.mulf %5, %5 : vector<128x32xf32>
    %cst_5 = arith.constant dense<0.000000e+00> : vector<128xf32>
    %7 = vector.multi_reduction <add>, %6, %cst_5 [1] : vector<128x32xf32> to vector<128xf32>
    %8 = vector.shape_cast %7 : vector<128xf32> to vector<128x1xf32>
    %cst_6 = arith.constant 1.000000e-24 : f32
    %9 = vector.broadcast %cst_6 : f32 to vector<128x1xf32>
    %10 = arith.maximumf %8, %9 : vector<128x1xf32>
    %11 = math.rsqrt %10 : vector<128x1xf32>
    %12 = vector.broadcast %11 : vector<128x1xf32> to vector<128x32xf32>
    %13 = arith.mulf %5, %12 : vector<128x32xf32>
    %14 = tpu.transpose %13, [1, 0] : vector<128x32xf32> -> vector<32x128xf32>
    %15 = arith.truncf %14 : vector<32x128xf32> to vector<32x128xbf16>
    %c0_7 = arith.constant 0 : index
    %c0_8 = arith.constant 0 : index
    %16 = vector.load %arg6[%c0_7, %c0_8] : memref<32x128xbf16, #tpu.memory_space<vmem>>, vector<32x128xbf16>
    tpu.vector_store %arg6[%c0_7, %c0_8], %15 {strides = array<i32>} : memref<32x128xbf16, #tpu.memory_space<vmem>>, vector<32x128xbf16>,
    %c0_9 = arith.constant 0 : index
    %c0_10 = arith.constant 0 : index
    %17 = vector.load %arg4[%c0_9, %c0_10] : memref<128x8xf32, #tpu.memory_space<vmem>>, vector<128x8xf32>
    %c0_11 = arith.constant 0 : index
    %c0_12 = arith.constant 0 : index
    %18 = vector.load %arg5[%c0_11, %c0_12] : memref<8x128xf32, #tpu.memory_space<vmem>>, vector<8x128xf32>
    %cst_13 = arith.constant dense<0.000000e+00> : vector<128x128xf32>
    %19 = tpu.matmul %17, %18, %cst_13 {dimension_numbers = #tpu.dot_dimension_numbers<[1], [0], [0], [1], [0, 0, 1, 1], [], []>} : vector<128x8xf32>, vector<8x128xf32>, vector<128x128xf32> -> vector<128x128xf32>
    %20 = arith.truncf %19 : vector<128x128xf32> to vector<128x128xbf16>
    %c0_14 = arith.constant 0 : index
    %c0_15 = arith.constant 0 : index
    %21 = vector.load %arg7[%c0_14, %c0_15] : memref<128x128xbf16, #tpu.memory_space<vmem>>, vector<128x128xbf16>
    tpu.vector_store %arg7[%c0_14, %c0_15], %20 {strides = array<i32>} : memref<128x128xbf16, #tpu.memory_space<vmem>>, vector<128x128xbf16>,
    return
  }
  func.func @transform_0(%arg0: i32) -> (i32, i32) {
    %c0_i32 = arith.constant 0 : i32
    %c0_i32_0 = arith.constant 0 : i32
    return %arg0, %c0_i32 : i32, i32
  }
  func.func @transform_1(%arg0: i32) -> (i32, i32) {
    %c0_i32 = arith.constant 0 : i32
    %c0_i32_0 = arith.constant 0 : i32
    %c0_i32_1 = arith.constant 0 : i32
    return %c0_i32, %c0_i32_0 : i32, i32
  }
  func.func @transform_2(%arg0: i32) -> (i32, i32) {
    %c0_i32 = arith.constant 0 : i32
    %c0_i32_0 = arith.constant 0 : i32
    %c0_i32_1 = arith.constant 0 : i32
    return %c0_i32, %c0_i32_0 : i32, i32
  }
  func.func @transform_3(%arg0: i32) -> (i32, i32) {
    %c0_i32 = arith.constant 0 : i32
    %c0_i32_0 = arith.constant 0 : i32
    return %arg0, %c0_i32 : i32, i32
  }
  func.func @transform_4(%arg0: i32) -> (i32, i32) {
    %c0_i32 = arith.constant 0 : i32
    %c0_i32_0 = arith.constant 0 : i32
    %c0_i32_1 = arith.constant 0 : i32
    return %c0_i32, %c0_i32_0 : i32, i32
  }
  func.func @transform_5(%arg0: i32) -> (i32, i32) {
    %c0_i32 = arith.constant 0 : i32
    %c0_i32_0 = arith.constant 0 : i32
    return %c0_i32, %arg0 : i32, i32
  }
  func.func @transform_6(%arg0: i32) -> (i32, i32) {
    %c0_i32 = arith.constant 0 : i32
    %c0_i32_0 = arith.constant 0 : i32
    return %arg0, %c0_i32 : i32, i32
  }
}

</mosaic_0001>

<bundles_post_ra>
// kernel: tpu_custom_call.1
= control target key start
LH: loop header
LB: loop body
LE: loop exit
PB: predicated region body
PF: predicated region fallthrough
CT: control target
= control target key end

     0   :  { %12 = vsyncpa [#allocation3], 0  ;;  %s1712_s0 = inlined_call_operand.vmem [shape: f32[256,32], index: 0, kind: input, shape index: {}]   ;;  %s1713_s1 = inlined_call_operand.vmem [shape: f32[32,32], index: 1, kind: input, shape index: {}]   ;;  %s1714_s2 = inlined_call_operand.vmem [shape: f32[1,32], index: 2, kind: input, shape index: {}]   ;;  %s1715_s3 = inlined_call_operand.vmem [shape: f32[256,8], index: 3, kind: input, shape index: {}]   ;;  %s1716_s4 = inlined_call_operand.vmem [shape: f32[8,128], index: 4, kind: input, shape index: {}]   ;;  %s1717_s5 = inlined_call_operand.hbm [shape: bf16[32,256], index: 5, kind: output, shape index: {0}]   ;;  %s1718_s6 = inlined_call_operand.hbm [shape: bf16[256,128], index: 6, kind: output, shape index: {1}]  }
   0x1   :  { %14 = vsyncpa [#allocation3 + $0x1], 0 }
   0x2   :  { %15 = vsyncpa [#allocation5], 0 }
   0x3   :  { %17 = vsyncpa [#allocation5 + $0x1], 0  ;;  %s1354_s21 = smov 0   ;;  %s1356_s22 = smov 0  }
   0x4   :  { %s1358_s23 = smov 0   ;;  %s1360_s24 = smov 0  }
   0x5 LB: > { %s1375_s25 = sadd.s32 4294967295, %s1314_s24   ;;  %s1027_s26 = sadd.s32 4294967294, %s1314_s24   ;;  %s1314_s24 = sphi %s1360_s24, %s1724_s24   ;;  %s1310_s23 = sphi %s1358_s23, %s1723_s23   ;;  %s1306_s22 = sphi %s1356_s22, %s1722_s22   ;;  %s1302_s21 = sphi %s1354_s21, %s1721_s21  }
   0x6   : > { %s1379_s27 = sadd.s32 1, %s1314_s24   ;;  %s145_s28 = sadd.s32 1, %s1310_s23 }
   0x7   : > { %s142_s29 = ssub.s32 %s1314_s24, %s1379_s27  ;;  %p155_p0 = scmp.ne.s32.totalorder %s1310_s23, %s1306_s22 }
   0x8   : > { %p143_p1 = scmp.eq.s32.totalorder %s142_s29, 0  ;;  %p156_p2 = scmp.eq.s32.totalorder %s1375_s25, 1 }
   0x9   : > { %p161_p3 = scmp.ne.s32.totalorder %s1306_s22, %s1302_s21  ;;  %p162_p4 = scmp.eq.s32.totalorder %s1027_s26, 1 }
   0xa   : > { %s1390_s30 = scalar_select %p143_p1, %s1310_s23, %s145_s28  }
   0xb   : > { %p1392_p5 = por %p156_p2, %p155_p0  ;;  %p1396_p6 = por %p162_p4, %p161_p3 }
   0xc   : > { %p1030_p7 = scmp.ge.s32.totalorder %s1314_s24, 1  ;;  %p233_p8 = scmp.lt.s32.totalorder %s1314_s24, 3 }
   0xe   : > { %p234_p9 = pnand %p1030_p7, %p233_p8 }
   0xf   : > { %s1033_s13 = sshll.u32 (!%p234_p9), %s1375_s25, 4  ;;  %s1076_s17 = sshll.u32 (!%p234_p9), %s1375_s25, 6 }
  0x10   : > { %237 = sbr.rel (%p234_p9) target bundleno = 493 (0x1ed), region = 40  ;;  %p274_p10 = scmp.lt.s32.totalorder (!%p234_p9), %s1033_s13, 31 }
  0x11   : > { %s916_s20 = scalar_lea.hbm (!%p234_p9), %s1718_s6, %s1076_s17  ;;  %s1240_s14 = scalar_lea.hbm (!%p234_p9), %s1718_s6, 128 }
  0x12   : > { %s919_s28 = sshll.u32 (!%p234_p9), %s916_s20, 4  ;;  %s920_s28 = int_to_ptr.hbm [resolvable:$true] %s919_s28 }
  0x13   : > { %s1234_s9 = sshra.s32 (!%p234_p9), %s920_s28, 4  ;;  %s1235_s9 = int_to_ptr.hbm [resolvable:$true] %s1234_s9 }
  0x14   : > { %s1236_s10 = scalar_lea.hbm (!%p234_p9), %s1235_s9, 64  ;;  %p1241_p0 = scmp.lt.s32.totalorder (!%p234_p9), %s1235_s9, %s1718_s6 }
  0x15   : > { %v305_v0 = vld [vmem:[%s1713_s1 + $0x18] sm:$0xff]  ;;  %v304_v1 = vld [vmem:[%s1713_s1 + $0x10] sm:$0xff]  ;;  %v303_v2 = vld [vmem:[%s1713_s1 + $0x8] sm:$0xff]  ;;  %s1726_s13 = smov (!%p274_p10, %s1033_s13), 31  ;;  %vm310_vm0 = vcmask 261120   ;;  %vm737_vm1 = vcmask 64512   ;;  %p1237_p11 = scmp.ne.s32.totalorder %s1235_s9, %s1236_s10 }
  0x16   : > { %371 = vmatpush.msra.mxu0 %v305_v0  ;;  %1135 = vmatpush.msra.mxu2 %v305_v0  ;;  %v302_v3 = vld [vmem:[%s1713_s1] sm:$0xff]  ;;  %s1034_s18 = sshll.u32 %s1726_s13, 3  ;;  %s1618_s13 = sand.u32 1, %s1306_s22  }
  0x17   : > { %s1423_s26 = scalar_lea.vmem %s1712_s0, %s1034_s18  ;;  %v1460_v20 = vld [vmem:[%s1714_s2] ss:$0 sm:$0xff]  ;;  %s1508_s11 = scalar_lea.vmem %s1715_s3, %s1034_s18 }
  0x18   : > { %372 = vmatpush.msra.mxu0 %v304_v1  ;;  %1136 = vmatpush.msra.mxu2 %v304_v1  ;;  %v286_v4 = vld [vmem:[%s1423_s26] sm:$0xff]  ;;  %v287_v6 = vld [vmem:[%s1423_s26 + $0x8] sm:$0xff]  ;;  %v288_v8 = vld [vmem:[%s1423_s26 + $0x10] sm:$0xff]  ;;  %s1032_s15 = sshll.u32 %s1618_s13, 6  ;;  %s889_s29 = scalar_lea.sflag [#allocation5], %s1618_s13 }
  0x19   : > { %v294_v5 = vld [vmem:[%s1423_s26 + $0x40] sm:$0xff]  ;;  %v295_v7 = vld [vmem:[%s1423_s26 + $0x48] sm:$0xff]  ;;  %v296_v9 = vld [vmem:[%s1423_s26 + $0x50] sm:$0xff]  ;;  %s1626_s16 = scalar_lea.vmem [#allocation4], %s1032_s15  ;;  %p1238_p12 = pnand %p1237_p11, %p1392_p5 }
  0x1a   : > { %373 = vmatpush.msra.mxu0 %v303_v2  ;;  %1137 = vmatpush.msra.mxu2 %v303_v2  ;;  %v289_v10 = vld [vmem:[%s1423_s26 + $0x18] sm:$0xff]  ;;  %v290_v12 = vld [vmem:[%s1423_s26 + $0x20] sm:$0xff]  ;;  %v291_v14 = vld [vmem:[%s1423_s26 + $0x28] sm:$0xff]  ;;  %p1242_p1 = scmp.lt.s32.totalorder %s1240_s14, %s1236_s10 }
  0x1b   : > { %v297_v11 = vld [vmem:[%s1423_s26 + $0x58] sm:$0xff]  ;;  %v298_v13 = vld [vmem:[%s1423_s26 + $0x60] sm:$0xff]  ;;  %v299_v15 = vld [vmem:[%s1423_s26 + $0x68] sm:$0xff]  ;;  %p1239_p13 = pneg %p1238_p12 }
  0x1c   : > { %374 = vmatpush.msra.mxu0 %v302_v3  ;;  %1138 = vmatpush.msra.mxu2 %v302_v3  ;;  %v292_v16 = vld [vmem:[%s1423_s26 + $0x30] sm:$0xff]  ;;  %v293_v18 = vld [vmem:[%s1423_s26 + $0x38] sm:$0xff]  ;;  %v736_v56 = vld [vmem:[%s1716_s4] sm:$0xff]  ;;  %p1243_p2 = por %p1242_p1, %p1241_p0 }
  0x1d   : > { %1037 = vmatmul.msk.f32.vlgmr.msra.gmra.mxu0 %vm310_vm0, %v286_v4  ;;  %1045 = vmatmul.msk.f32.vlgmr.msra.gmra.mxu2 %vm310_vm0, %v294_v5  ;;  %v300_v17 = vld [vmem:[%s1423_s26 + $0x70] sm:$0xff]  ;;  %v301_v19 = vld [vmem:[%s1423_s26 + $0x78] sm:$0xff]  ;;  %v720_v57 = vld [vmem:[%s1508_s11] sm:$0xff]  ;;  %s917_s26 = sshll.u32 %s1626_s16, 4  ;;  %s918_s26 = int_to_ptr.vmem [resolvable:$true] %s917_s26 }
  0x1e   : > { %801 = vmatpush.msra.mxu1 %v736_v56  ;;  %1139 = vmatpush.msra.mxu3 %v736_v56  ;;  %v721_v4 = vld [vmem:[%s1508_s11 + $0x8] sm:$0xff]  ;;  %p1244_p3 = pnand %p1243_p2, %p1239_p13 }
  0x1f   : > { %1053 = vmatmul.msk.f32.vlgmr.msra.gmra.mxu1 %vm737_vm1, %v720_v57 }
  0x25   : > { %1038 = vmatmul.msk.f32.gmra.mxu0 %vm310_vm0, %v287_v6  ;;  %1046 = vmatmul.msk.f32.gmra.mxu2 %vm310_vm0, %v295_v7 }
  0x27   : > { %1054 = vmatmul.msk.f32.gmra.mxu1 %vm737_vm1, %v721_v4 }
  0x2d   : > { %1039 = vmatmul.msk.f32.gmra.mxu0 %vm310_vm0, %v288_v8  ;;  %1047 = vmatmul.msk.f32.gmra.mxu2 %vm310_vm0, %v296_v9 }
  0x35   : > { %1040 = vmatmul.msk.f32.gmra.mxu0 %vm310_vm0, %v289_v10  ;;  %1048 = vmatmul.msk.f32.gmra.mxu2 %vm310_vm0, %v297_v11 }
  0x3d   : > { %1041 = vmatmul.msk.f32.gmra.mxu0 %vm310_vm0, %v290_v12  ;;  %1049 = vmatmul.msk.f32.gmra.mxu2 %vm310_vm0, %v298_v13 }
  0x45   : > { %1042 = vmatmul.msk.f32.gmra.mxu0 %vm310_vm0, %v291_v14  ;;  %1050 = vmatmul.msk.f32.gmra.mxu2 %vm310_vm0, %v299_v15 }
  0x4d   : > { %1043 = vmatmul.msk.f32.gmra.mxu0 %vm310_vm0, %v292_v16  ;;  %1051 = vmatmul.msk.f32.gmra.mxu2 %vm310_vm0, %v300_v17  ;;  %v722_v16 = vld [vmem:[%s1508_s11 + $0x10] sm:$0xff] }
  0x4e   : > { %1055 = vmatmul.msk.f32.gmra.mxu1 %vm737_vm1, %v722_v16 }
  0x55   : > { %1044 = vmatmul.msk.f32.gmra.mxu0 %vm310_vm0, %v293_v18  ;;  %1052 = vmatmul.msk.f32.gmra.mxu2 %vm310_vm0, %v301_v19 }
  0x9a   : > { %v376_v21 = vpop.f32.mrf.mxu0 }
  0x9b   : > { %v1463_v22 = vadd.f32 %v1460_v20, %v376_v21 }
  0x9d   : > { %v424_v23 = vmul.f32 %v1463_v22, %v1463_v22 }
  0x9f   : > { %v440_v24 = vsel %vm310_vm0, %v424_v23, 0.0 }
  0xa0   : > { %v400_v25 = vpop.f32.mrf.mxu2  ;;  %441 = vadd.xlane.f32.xlu0 %v440_v24 }
  0xa1   : > { %v1511_v52 = vadd.f32 %v1460_v20, %v400_v25  ;;  %v723_v25 = vld [vmem:[%s1508_s11 + $0x18] sm:$0xff] }
  0xa2   : > { %v379_v26 = vpop.f32.mrf.mxu0  ;;  %1056 = vmatmul.msk.f32.gmra.mxu1 %vm737_vm1, %v723_v25 }
  0xa3   : > { %v1469_v27 = vadd.f32 %v1460_v20, %v379_v26  ;;  %v432_v61 = vmul.f32 %v1511_v52, %v1511_v52 }
  0xa5   : > { %v425_v28 = vmul.f32 %v1469_v27, %v1469_v27  ;;  %v464_v1 = vsel %vm310_vm0, %v432_v61, 0.0 }
  0xa7   : > { %v443_v29 = vsel %vm310_vm0, %v425_v28, 0.0 }
  0xa8   : > { %v403_v30 = vpop.f32.mrf.mxu2  ;;  %444 = vadd.xlane.f32.xlu0 %v443_v29  ;;  %v724_v29 = vld [vmem:[%s1508_s11 + $0x20] sm:$0xff] }
  0xa9   : > { %v1538_v3 = vadd.f32 %v1460_v20, %v403_v30  ;;  %v726_v30 = vld [vmem:[%s1508_s11 + $0x30] sm:$0xff] }
  0xaa   : > { %v382_v31 = vpop.f32.mrf.mxu0  ;;  %1057 = vmatmul.msk.f32.gmra.mxu1 %vm737_vm1, %v724_v29 }
  0xab   : > { %v1475_v32 = vadd.f32 %v1460_v20, %v382_v31  ;;  %v433_v9 = vmul.f32 %v1538_v3, %v1538_v3  ;;  %v729_v31 = vld [vmem:[%s1508_s11 + $0x48] sm:$0xff] }
  0xac   : > { %1062 = vmatmul.msk.f32.vlgmr.msra.gmra.mxu3 %vm737_vm1, %v729_v31 }
  0xad   : > { %v426_v33 = vmul.f32 %v1475_v32, %v1475_v32  ;;  %v467_v15 = vsel %vm310_vm0, %v433_v9, 0.0 }
  0xaf   : > { %v446_v34 = vsel %vm310_vm0, %v426_v33, 0.0  ;;  %v727_v33 = vld [vmem:[%s1508_s11 + $0x38] sm:$0xff] }
  0xb0   : > { %v406_v35 = vpop.f32.mrf.mxu2  ;;  %447 = vadd.xlane.f32.xlu1 %v446_v34 }
  0xb1   : > { %v1486_v39 = vadd.f32 %v1460_v20, %v406_v35  ;;  %v730_v35 = vld [vmem:[%s1508_s11 + $0x50] sm:$0xff] }
  0xb2   : > { %v385_v36 = vpop.f32.mrf.mxu0 }
  0xb3   : > { %v1481_v37 = vadd.f32 %v1460_v20, %v385_v36  ;;  %v434_v44 = vmul.f32 %v1486_v39, %v1486_v39 }
  0xb4   : > { %1063 = vmatmul.msk.f32.gmra.mxu3 %vm737_vm1, %v730_v35  ;;  %v735_v35 = vld [vmem:[%s1508_s11 + $0x78] sm:$0xff] }
  0xb5   : > { %v427_v38 = vmul.f32 %v1481_v37, %v1481_v37  ;;  %v470_v47 = vsel %vm310_vm0, %v434_v44, 0.0 }
  0xb7   : > { %v449_v40 = vsel %vm310_vm0, %v427_v38, 0.0  ;;  %v728_v38 = vld [vmem:[%s1508_s11 + $0x40] sm:$0xff] }
  0xb8   : > { %v409_v41 = vpop.f32.mrf.mxu2  ;;  %450 = vadd.xlane.f32.xlu1 %v449_v40 }
  0xb9   : > { %v1533_v0 = vadd.f32 %v1460_v20, %v409_v41  ;;  %v731_v41 = vld [vmem:[%s1508_s11 + $0x58] sm:$0xff] }
  0xba   : > { %v388_v42 = vpop.f32.mrf.mxu0 }
  0xbb   : > { %v1490_v43 = vadd.f32 %v1460_v20, %v388_v42  ;;  %v435_v8 = vmul.f32 %v1533_v0, %v1533_v0 }
  0xbc   : > { %1064 = vmatmul.msk.f32.gmra.mxu3 %vm737_vm1, %v731_v41 }
  0xbd   : > { %v428_v45 = vmul.f32 %v1490_v43, %v1490_v43  ;;  %v473_v12 = vsel %vm310_vm0, %v435_v8, 0.0 }
  0xbf   : > { %v452_v46 = vsel %vm310_vm0, %v428_v45, 0.0 }
  0xc0   : > { %v412_v48 = vpop.f32.mrf.mxu2  ;;  %453 = vadd.xlane.f32.xlu2 %v452_v46  ;;  %471 = vadd.xlane.f32.xlu1 %v470_v47 }
  0xc1   : > { %v1557_v14 = vadd.f32 %v1460_v20, %v412_v48 }
  0xc2   : > { %v391_v49 = vpop.f32.mrf.mxu0 }
  0xc3   : > { %v1499_v50 = vadd.f32 %v1460_v20, %v391_v49  ;;  %v436_v19 = vmul.f32 %v1557_v14, %v1557_v14 }
  0xc5   : > { %v429_v51 = vmul.f32 %v1499_v50, %v1499_v50  ;;  %v476_v24 = vsel %vm310_vm0, %v436_v19, 0.0 }
  0xc7   : > { %v455_v53 = vsel %vm310_vm0, %v429_v51, 0.0  ;;  %v732_v51 = vld [vmem:[%s1508_s11 + $0x60] sm:$0xff] }
  0xc8   : > { %v415_v54 = vpop.f32.mrf.mxu2  ;;  %456 = vadd.xlane.f32.xlu2 %v455_v53  ;;  %1065 = vmatmul.msk.f32.gmra.mxu3 %vm737_vm1, %v732_v51 }
  0xc9   : > { %v1515_v55 = vadd.f32 %v1460_v20, %v415_v54 }
  0xca   : > { %v394_v58 = vpop.f32.mrf.mxu0 }
  0xcb   : > { %v1522_v59 = vadd.f32 %v1460_v20, %v394_v58  ;;  %v437_v60 = vmul.f32 %v1515_v55, %v1515_v55 }
  0xcd   : > { %v479_v62 = vsel %vm310_vm0, %v437_v60, 0.0  ;;  %v430_v63 = vmul.f32 %v1522_v59, %v1522_v59 }
  0xce   : > { %480 = vadd.xlane.f32.xlu1 %v479_v62 }
  0xcf   : > { %v458_v2 = vsel %vm310_vm0, %v430_v63, 0.0 }
  0xd0   : > { %465 = vadd.xlane.f32.xlu2 %v464_v1  ;;  %459 = vadd.xlane.f32.xlu0 %v458_v2  ;;  %v418_v5 = vpop.f32.mrf.mxu2  ;;  %v733_v2 = vld [vmem:[%s1508_s11 + $0x68] sm:$0xff] }
  0xd1   : > { %v1552_v11 = vadd.f32 %v1460_v20, %v418_v5  ;;  %1066 = vmatmul.msk.f32.gmra.mxu3 %vm737_vm1, %v733_v2 }
  0xd2   : > { %v397_v6 = vpop.f32.mrf.mxu0 }
  0xd3   : > { %v1542_v7 = vadd.f32 %v1460_v20, %v397_v6  ;;  %v438_v17 = vmul.f32 %v1552_v11, %v1552_v11 }
  0xd5   : > { %v431_v10 = vmul.f32 %v1542_v7, %v1542_v7  ;;  %v482_v21 = vsel %vm310_vm0, %v438_v17, 0.0 }
  0xd7   : > { %v461_v13 = vsel %vm310_vm0, %v431_v10, 0.0 }
  0xd8   : > { %474 = vadd.xlane.f32.xlu2 %v473_v12  ;;  %462 = vadd.xlane.f32.xlu1 %v461_v13  ;;  %v421_v18 = vpop.f32.mrf.mxu2 }
  0xd9   : > { %468 = vadd.xlane.f32.xlu0 %v467_v15  ;;  %v1568_v23 = vadd.f32 %v1460_v20, %v421_v18  ;;  %v725_v20 = vld [vmem:[%s1508_s11 + $0x28] sm:$0xff] }
  0xda   : > { %1058 = vmatmul.msk.f32.gmra.mxu1 %vm737_vm1, %v725_v20 }
  0xdb   : > { %v439_v26 = vmul.f32 %v1568_v23, %v1568_v23 }
  0xdd   : > { %v485_v28 = vsel %vm310_vm0, %v439_v26, 0.0 }
  0xe0   : > { %483 = vadd.xlane.f32.xlu2 %v482_v21  ;;  %v734_v21 = vld [vmem:[%s1508_s11 + $0x70] sm:$0xff] }
  0xe1   : > { %477 = vadd.xlane.f32.xlu0 %v476_v24  ;;  %1067 = vmatmul.msk.f32.gmra.mxu3 %vm737_vm1, %v734_v21 }
  0xe2   : > { %1059 = vmatmul.msk.f32.gmra.mxu1 %vm737_vm1, %v726_v30 }
  0xe9   : > { %486 = vadd.xlane.f32.xlu0 %v485_v28  ;;  %1068 = vmatmul.msk.f32.gmra.mxu3 %vm737_vm1, %v735_v35 }
  0xea   : > { %1060 = vmatmul.msk.f32.gmra.mxu1 %vm737_vm1, %v727_v33 }
  0xf2   : > { %1061 = vmatmul.msk.f32.gmra.mxu1 %vm737_vm1, %v728_v38 }
 0x113   : > { %v442_v34 = vpop.xlane.xlu0 %441 }
 0x114   : > { %v488_v36 = vmax.f32 %v442_v34, 1e-24 }
 0x116   : > { %1188 = vrsqrt.f32 %v488_v36  ;;  %vm510_vm3 = vweird.f32 %v488_v36 }
 0x11b   : > { %v445_v40 = vpop.xlane.xlu0 %444 }
 0x11c   : > { %v1189_v42 = vpop.eup %1188  ;;  %v489_v44 = vmax.f32 %v445_v40, 1e-24 }
 0x11d   : > { %v505_v45 = vmul.f32 %v1189_v42, %v488_v36  ;;  %vm511_vm2 = vweird.f32 %v1189_v42 }
 0x11e   : > { %1190 = vrsqrt.f32 %v489_v44  ;;  %vm512_vm4 = vmor %vm510_vm3, %vm511_vm2  ;;  %vm520_vm6 = vweird.f32 %v489_v44 }
 0x11f   : > { %v506_v46 = vmul.f32 %v1189_v42, %v505_v45 }
 0x121   : > { %v507_v47 = vmul.f32 0.5, %v506_v46 }
 0x123   : > { %v508_v48 = vsub.f32 1.5, %v507_v47  ;;  %v448_v49 = vpop.xlane.xlu1 %447 }
 0x124   : > { %v1191_v53 = vpop.eup %1190  ;;  %v490_v54 = vmax.f32 %v448_v49, 1e-24 }
 0x125   : > { %v515_v56 = vmul.f32 %v1191_v53, %v489_v44  ;;  %v509_v57 = vmul.f32 %v1189_v42, %v508_v48  ;;  %vm521_vm5 = vweird.f32 %v1191_v53 }
 0x126   : > { %1192 = vrsqrt.f32 %v490_v54  ;;  %vm522_vm7 = vmor %vm520_vm6, %vm521_vm5  ;;  %vm530_vm9 = vweird.f32 %v490_v54 }
 0x127   : > { %v516_v58 = vmul.f32 %v1191_v53, %v515_v56  ;;  %v513_v60 = vsel %vm512_vm4, %v1189_v42, %v509_v57 }
 0x128   : > { %v664_v61 = vmul.f32 %v513_v60, %v1463_v22 }
 0x129   : > { %v517_v62 = vmul.f32 0.5, %v516_v58 }
 0x12a   : > { %680 = vxpose.xlu1.b32.start [1/16] (narrow) %v664_v61, 32 }
 0x12b   : > { %v518_v63 = vsub.f32 1.5, %v517_v62  ;;  %v451_v1 = vpop.xlane.xlu1 %450 }
 0x12c   : > { %v1193_v4 = vpop.eup %1192  ;;  %v491_v5 = vmax.f32 %v451_v1, 1e-24 }
 0x12d   : > { %v525_v6 = vmul.f32 %v1193_v4, %v490_v54  ;;  %v519_v8 = vmul.f32 %v1191_v53, %v518_v63  ;;  %vm531_vm8 = vweird.f32 %v1193_v4 }
 0x12e   : > { %1194 = vrsqrt.f32 %v491_v5  ;;  %vm532_vm10 = vmor %vm530_vm9, %vm531_vm8  ;;  %vm540_vm12 = vweird.f32 %v491_v5 }
 0x12f   : > { %v526_v9 = vmul.f32 %v1193_v4, %v525_v6  ;;  %v523_v10 = vsel %vm522_vm7, %v1191_v53, %v519_v8 }
 0x130   : > { %v665_v22 = vmul.f32 %v523_v10, %v1469_v27 }
 0x131   : > { %v527_v12 = vmul.f32 0.5, %v526_v9 }
 0x132   : > { %681 = vxpose.xlu1.b32.cont [2/16] (narrow) %v665_v22, 32 }
 0x133   : > { %v528_v13 = vsub.f32 1.5, %v527_v12  ;;  %v454_v15 = vpop.xlane.xlu2 %453  ;;  %v472_v29 = vpop.xlane.xlu1 %471 }
 0x134   : > { %v1195_v16 = vpop.eup %1194  ;;  %v492_v17 = vmax.f32 %v454_v15, 1e-24  ;;  %v803_v12 = vpop.f32.mrf.mxu1  ;;  %v1615_v15 = vmax.f32 %v472_v29, 1e-24 }
 0x135   : > { %v535_v18 = vmul.f32 %v1195_v16, %v491_v5  ;;  %v529_v19 = vmul.f32 %v1193_v4, %v528_v13  ;;  %vm541_vm11 = vweird.f32 %v1195_v16 }
 0x136   : > { %1196 = vrsqrt.f32 %v492_v17  ;;  %vm542_vm13 = vmor %vm540_vm12, %vm541_vm11  ;;  %vm550_vm15 = vweird.f32 %v492_v17 }
 0x137   : > { %v536_v24 = vmul.f32 %v1195_v16, %v535_v18  ;;  %v533_v25 = vsel %vm532_vm10, %v1193_v4, %v529_v19 }
 0x138   : > { %v666_v27 = vmul.f32 %v533_v25, %v1475_v32 }
 0x139   : > { %v537_v26 = vmul.f32 0.5, %v536_v24 }
 0x13a   : > { %682 = vxpose.xlu1.b32.cont [3/16] (narrow) %v666_v27, 32 }
 0x13b   : > { %v538_v28 = vsub.f32 1.5, %v537_v26  ;;  %v457_v20 = vpop.xlane.xlu2 %456 }
 0x13c   : > { %v1197_v30 = vpop.eup %1196  ;;  %v493_v31 = vmax.f32 %v457_v20, 1e-24  ;;  %v806_v29 = vpop.f32.mrf.mxu1 }
 0x13d   : > { %v545_v33 = vmul.f32 %v1197_v30, %v492_v17  ;;  %v539_v34 = vmul.f32 %v1195_v16, %v538_v28  ;;  %vm551_vm14 = vweird.f32 %v1197_v30 }
 0x13e   : > { %1198 = vrsqrt.f32 %v493_v31  ;;  %vm552_vm0 = vmor %vm550_vm15, %vm551_vm14  ;;  %vm560_vm2 = vweird.f32 %v493_v31 }
 0x13f   : > { %v546_v36 = vmul.f32 %v1197_v30, %v545_v33  ;;  %v543_v38 = vsel %vm542_vm13, %v1195_v16, %v539_v34 }
 0x140   : > { %v667_v32 = vmul.f32 %v543_v38, %v1481_v37 }
 0x141   : > { %v547_v40 = vmul.f32 0.5, %v546_v36  ;;  %v1604_v42 = vpop.xlane.xlu1 %480 }
 0x142   : > { %683 = vxpose.xlu1.b32.cont [4/16] (narrow) %v667_v32, 32 }
 0x143   : > { %v548_v41 = vsub.f32 1.5, %v547_v40  ;;  %v460_v44 = vpop.xlane.xlu0 %459  ;;  %v466_v46 = vpop.xlane.xlu2 %465 }
 0x144   : > { %v1199_v45 = vpop.eup %1198  ;;  %v494_v48 = vmax.f32 %v460_v44, 1e-24  ;;  %v1606_v53 = vmax.f32 %v466_v46, 1e-24  ;;  %v809_v44 = vpop.f32.mrf.mxu1 }
 0x145   : > { %v555_v47 = vmul.f32 %v1199_v45, %v493_v31  ;;  %v549_v49 = vmul.f32 %v1197_v30, %v548_v41  ;;  %vm561_vm1 = vweird.f32 %v1199_v45 }
 0x146   : > { %1200 = vrsqrt.f32 %v494_v48  ;;  %vm562_vm3 = vmor %vm560_vm2, %vm561_vm1  ;;  %vm570_vm5 = vweird.f32 %v494_v48  ;;  %vm590_vm11 = vweird.f32 %v1606_v53  ;;  %vm610_vm1 = vweird.f32 %v1615_v15 }
 0x147   : > { %v556_v51 = vmul.f32 %v1199_v45, %v555_v47  ;;  %v553_v54 = vsel %vm552_vm0, %v1197_v30, %v549_v49  ;;  %1202 = vrsqrt.f32 %v1606_v53  ;;  %v1090_v30 = vpack.c.bf16 %v806_v29, %v803_v12 }
 0x148   : > { %v668_v37 = vmul.f32 %v553_v54, %v1490_v43 }
 0x149   : > { %v557_v56 = vmul.f32 0.5, %v556_v51  ;;  %1091 = vst [vmem:[%s1626_s16] sm:$0xff] %v1090_v30  }
 0x14a   : > { %684 = vxpose.xlu1.b32.cont [5/16] (narrow) %v668_v37, 32 }
 0x14b   : > { %v463_v57 = vpop.xlane.xlu1 %462  ;;  %v558_v58 = vsub.f32 1.5, %v557_v56  ;;  %v475_v27 = vpop.xlane.xlu2 %474 }
 0x14c   : > { %v495_v60 = vmax.f32 %v463_v57, 1e-24  ;;  %v469_v61 = vpop.xlane.xlu0 %468  ;;  %v1201_v62 = vpop.eup %1200  ;;  %v1624_v31 = vmax.f32 %v475_v27, 1e-24  ;;  %v501_v57 = vmax.f32 %v1604_v42, 1e-24 }
 0x14d   : > { %v565_v63 = vmul.f32 %v1201_v62, %v494_v48  ;;  %v1610_v1 = vmax.f32 %v469_v61, 1e-24  ;;  %v559_v4 = vmul.f32 %v1199_v45, %v558_v58  ;;  %v1203_v5 = vpop.eup %1202  ;;  %vm571_vm4 = vweird.f32 %v1201_v62  ;;  %v812_v56 = vpop.f32.mrf.mxu1 }
 0x14e   : > { %1204 = vrsqrt.f32 %v495_v60  ;;  %v585_v9 = vmul.f32 %v1203_v5, %v1606_v53  ;;  %vm572_vm6 = vmor %vm570_vm5, %vm571_vm4  ;;  %vm580_vm8 = vweird.f32 %v495_v60  ;;  %vm591_vm10 = vweird.f32 %v1203_v5 }
 0x14f   : > { %v566_v2 = vmul.f32 %v1201_v62, %v565_v63  ;;  %v563_v6 = vsel %vm562_vm3, %v1199_v45, %v559_v4  ;;  %1206 = vrsqrt.f32 %v1610_v1  ;;  %vm592_vm12 = vmor %vm590_vm11, %vm591_vm10  ;;  %vm600_vm14 = vweird.f32 %v1610_v1 }
 0x150   : > { %v669_v8 = vmul.f32 %v563_v6, %v1499_v50  ;;  %v586_v16 = vmul.f32 %v1203_v5, %v585_v9  ;;  %1208 = vrsqrt.f32 %v1615_v15  ;;  %v1095_v53 = vpack.c.bf16 %v812_v56, %v809_v44 }
 0x151   : > { %v567_v43 = vmul.f32 0.5, %v566_v2  ;;  %1210 = vrsqrt.f32 %v1624_v31  ;;  %vm620_vm4 = vweird.f32 %v1624_v31  ;;  %vm640_vm10 = vweird.f32 %v501_v57 }
 0x152   : > { %685 = vxpose.xlu1.b32.cont [6/16] (narrow) %v669_v8, 32  ;;  %v587_v25 = vmul.f32 0.5, %v586_v16  ;;  %1128 = vst [vmem:[%s1626_s16 + $0x8] sm:$0xff] %v1095_v53  }
 0x153   : > { %v568_v10 = vsub.f32 1.5, %v567_v43  ;;  %v484_v2 = vpop.xlane.xlu2 %483 }
 0x154   : > { %v1205_v22 = vpop.eup %1204  ;;  %v588_v33 = vsub.f32 1.5, %v587_v25  ;;  %v478_v40 = vpop.xlane.xlu0 %477  ;;  %v502_v42 = vmax.f32 %v484_v2, 1e-24 }
 0x155   : > { %v575_v13 = vmul.f32 %v1205_v22, %v495_v60  ;;  %v569_v18 = vmul.f32 %v1201_v62, %v568_v10  ;;  %v1207_v19 = vpop.eup %1206  ;;  %vm581_vm7 = vweird.f32 %v1205_v22  ;;  %v1633_v45 = vmax.f32 %v478_v40, 1e-24 }
 0x156   : > { %v595_v28 = vmul.f32 %v1207_v19, %v1610_v1  ;;  %vm582_vm9 = vmor %vm580_vm8, %vm581_vm7  ;;  %v589_v41 = vmul.f32 %v1203_v5, %v588_v33  ;;  %vm601_vm13 = vweird.f32 %v1207_v19  ;;  %v815_v1 = vpop.f32.mrf.mxu1 }
 0x157   : > { %v576_v17 = vmul.f32 %v1205_v22, %v575_v13  ;;  %v573_v21 = vsel %vm572_vm6, %v1201_v62, %v569_v18  ;;  %1212 = vrsqrt.f32 %v1633_v45  ;;  %vm602_vm15 = vmor %vm600_vm14, %vm601_vm13  ;;  %vm630_vm7 = vweird.f32 %v1633_v45 }
 0x158   : > { %v670_v24 = vmul.f32 %v573_v21, %v1522_v59  ;;  %v596_v34 = vmul.f32 %v1207_v19, %v595_v28  ;;  %v1209_v59 = vpop.eup %1208  ;;  %v593_v48 = vsel %vm592_vm12, %v1203_v5, %v589_v41  ;;  %1214 = vrsqrt.f32 %v501_v57 }
 0x159   : > { %v577_v50 = vmul.f32 0.5, %v576_v17  ;;  %v605_v38 = vmul.f32 %v1209_v59, %v1615_v15  ;;  %v1211_v49 = vpop.eup %1210  ;;  %vm611_vm0 = vweird.f32 %v1209_v59  ;;  %1216 = vrsqrt.f32 %v502_v42 }
 0x15a   : > { %686 = vxpose.xlu1.b32.cont [7/16] (narrow) %v670_v24, 32  ;;  %v597_v32 = vmul.f32 0.5, %v596_v34  ;;  %v615_v54 = vmul.f32 %v1211_v49, %v1624_v31  ;;  %vm612_vm2 = vmor %vm610_vm1, %vm611_vm0  ;;  %vm621_vm3 = vweird.f32 %v1211_v49  ;;  %vm650_vm12 = vweird.f32 %v502_v42 }
 0x15b   : > { %v578_v26 = vsub.f32 1.5, %v577_v50  ;;  %v606_v46 = vmul.f32 %v1209_v59, %v605_v38  ;;  %vm622_vm5 = vmor %vm620_vm4, %vm621_vm3 }
 0x15c   : > { %v598_v47 = vsub.f32 1.5, %v597_v32  ;;  %v616_v60 = vmul.f32 %v1211_v49, %v615_v54  ;;  %v487_v12 = vpop.xlane.xlu0 %486 }
 0x15d   : > { %v579_v20 = vmul.f32 %v1205_v22, %v578_v26  ;;  %v607_v51 = vmul.f32 0.5, %v606_v46  ;;  %v1213_v62 = vpop.eup %1212  ;;  %v503_v15 = vmax.f32 %v487_v12, 1e-24 }
 0x15e   : > { %v599_v37 = vmul.f32 %v1207_v19, %v598_v47  ;;  %v617_v63 = vmul.f32 0.5, %v616_v60  ;;  %v625_v4 = vmul.f32 %v1213_v62, %v1633_v45  ;;  %v1215_v9 = vpop.eup %1214  ;;  %v818_v16 = vpop.f32.mrf.mxu1  ;;  %vm631_vm6 = vweird.f32 %v1213_v62 }
 0x15f   : > { %v583_v35 = vsel %vm582_vm9, %v1205_v22, %v579_v20  ;;  %v608_v58 = vsub.f32 1.5, %v607_v51  ;;  %v1100_v50 = vpack.c.bf16 %v818_v16, %v815_v1  ;;  %v1217_v21 = vpop.eup %1216  ;;  %1218 = vrsqrt.f32 %v503_v15  ;;  %vm632_vm8 = vmor %vm630_vm7, %vm631_vm6 }
 0x160   : > { %v671_v36 = vmul.f32 %v583_v35, %v1542_v7  ;;  %v672_v7 = vmul.f32 %v593_v48, %v1511_v52  ;;  %v603_v61 = vsel %vm602_vm15, %v1207_v19, %v599_v37  ;;  %v618_v43 = vsub.f32 1.5, %v617_v63 }
 0x161   : > { %v673_v52 = vmul.f32 %v603_v61, %v1538_v3  ;;  %v609_v5 = vmul.f32 %v1209_v59, %v608_v58  ;;  %v626_v6 = vmul.f32 %v1213_v62, %v625_v4  ;;  %v635_v3 = vmul.f32 %v1215_v9, %v501_v57  ;;  %1129 = vst [vmem:[%s1626_s16 + $0x10] sm:$0xff] %v1100_v50  }
 0x162   : > { %687 = vxpose.xlu1.b32.cont [8/16] (narrow) %v671_v36, 32  ;;  %v619_v13 = vmul.f32 %v1211_v49, %v618_v43  ;;  %v645_v25 = vmul.f32 %v1217_v21, %v502_v42  ;;  %vm641_vm9 = vweird.f32 %v1215_v9  ;;  %vm651_vm13 = vweird.f32 %v1217_v21 }
 0x163   : > { %v613_v8 = vsel %vm612_vm2, %v1209_v59, %v609_v5  ;;  %v627_v22 = vmul.f32 0.5, %v626_v6  ;;  %v636_v17 = vmul.f32 %v1215_v9, %v635_v3  ;;  %vm642_vm11 = vmor %vm640_vm10, %vm641_vm9  ;;  %v830_v59 = vpop.f32.mrf.mxu3  ;;  %vm660_vm15 = vweird.f32 %v503_v15 }
 0x164   : > { %v674_v10 = vmul.f32 %v613_v8, %v1486_v39  ;;  %v623_v19 = vsel %vm622_vm5, %v1211_v49, %v619_v13  ;;  %v646_v29 = vmul.f32 %v1217_v21, %v645_v25  ;;  %vm652_vm14 = vmor %vm650_vm12, %vm651_vm13 }
 0x165   : > { %v628_v18 = vsub.f32 1.5, %v627_v22  ;;  %v675_v39 = vmul.f32 %v623_v19, %v1533_v0  ;;  %v637_v24 = vmul.f32 0.5, %v636_v17  ;;  %v1219_v30 = vpop.eup %1218 }
 0x166   : > { %v821_v26 = vpop.f32.mrf.mxu1  ;;  %v647_v33 = vmul.f32 0.5, %v646_v29  ;;  %v655_v34 = vmul.f32 %v1219_v30, %v503_v15  ;;  %vm661_vm0 = vweird.f32 %v1219_v30 }
 0x167   : > { %v629_v27 = vmul.f32 %v1213_v62, %v628_v18  ;;  %v638_v28 = vsub.f32 1.5, %v637_v24  ;;  %vm662_vm1 = vmor %vm660_vm15, %vm661_vm0 }
 0x168   : > { %v648_v36 = vsub.f32 1.5, %v647_v33  ;;  %v656_v38 = vmul.f32 %v1219_v30, %v655_v34 }
 0x169   : > { %v633_v20 = vsel %vm632_vm8, %v1213_v62, %v629_v27  ;;  %v639_v0 = vmul.f32 %v1215_v9, %v638_v28 }
 0x16a   : > { %688 = vxpose.xlu1.b32.cont [9/16] (narrow) %v672_v7, 32  ;;  %v676_v31 = vmul.f32 %v633_v20, %v1557_v14  ;;  %v649_v41 = vmul.f32 %v1217_v21, %v648_v36  ;;  %v657_v44 = vmul.f32 0.5, %v656_v38 }
 0x16b   : > { %v643_v32 = vsel %vm642_vm11, %v1215_v9, %v639_v0  ;;  %v833_v46 = vpop.f32.mrf.mxu3 }
 0x16c   : > { %v677_v14 = vmul.f32 %v643_v32, %v1515_v55  ;;  %v658_v47 = vsub.f32 1.5, %v657_v44  ;;  %v653_v48 = vsel %vm652_vm14, %v1217_v21, %v649_v41 }
 0x16d   : > { %v678_v7 = vmul.f32 %v653_v48, %v1552_v11 }
 0x16e   : > { %v824_v35 = vpop.f32.mrf.mxu1  ;;  %v659_v51 = vmul.f32 %v1219_v30, %v658_v47 }
 0x16f   : > { %v1105_v40 = vpack.c.bf16 %v824_v35, %v821_v26 }
 0x170   : > { %v663_v54 = vsel %vm662_vm1, %v1219_v30, %v659_v51 }
 0x171   : > { %1130 = vst [vmem:[%s1626_s16 + $0x18] sm:$0xff] %v1105_v40   ;;  %v679_v56 = vmul.f32 %v663_v54, %v1568_v23 }
 0x172   : > { %689 = vxpose.xlu1.b32.cont [10/16] (narrow) %v673_v52, 32 }
 0x173   : > { %v836_v55 = vpop.f32.mrf.mxu3 }
 0x174   : > { %v1115_v37 = vpack.c.bf16 %v836_v55, %v833_v46 }
 0x176   : > { %v827_v45 = vpop.f32.mrf.mxu1  ;;  %1132 = vst [vmem:[%s1626_s16 + $0x28] sm:$0xff] %v1115_v37  }
 0x177   : > { %v1110_v49 = vpack.c.bf16 %v830_v59, %v827_v45 }
 0x179   : > { %1131 = vst [vmem:[%s1626_s16 + $0x20] sm:$0xff] %v1110_v49  }
 0x17a   : > { %690 = vxpose.xlu1.b32.cont [11/16] (narrow) %v674_v10, 32 }
 0x17b   : > { %v839_v53 = vpop.f32.mrf.mxu3 }
 0x182   : > { %691 = vxpose.xlu1.b32.cont [12/16] (narrow) %v675_v39, 32 }
 0x183   : > { %v842_v57 = vpop.f32.mrf.mxu3 }
 0x184   : > { %v1120_v58 = vpack.c.bf16 %v842_v57, %v839_v53 }
 0x186   : > { %1133 = vst [vmem:[%s1626_s16 + $0x30] sm:$0xff] %v1120_v58  }
 0x18a   : > { %692 = vxpose.xlu1.b32.cont [13/16] (narrow) %v676_v31, 32 }
 0x18b   : > { %v845_v60 = vpop.f32.mrf.mxu3 }
 0x192   : > { %693 = vxpose.xlu1.b32.cont [14/16] (narrow) %v677_v14, 32 }
 0x193   : > { %v848_v11 = vpop.f32.mrf.mxu3 }
 0x194   : > { %v1125_v61 = vpack.c.bf16 %v848_v11, %v845_v60 }
 0x196   : > { %1134 = vst [vmem:[%s1626_s16 + $0x38] sm:$0xff] %v1125_v61  }
 0x19a   : > { %694 = vxpose.xlu1.b32.cont [15/16] (narrow) %v678_v7, 32 }
 0x1a2   : > { %695 = vxpose.xlu1.b32.end [16/16] (narrow) %v679_v56, 32 }
 0x1a3   : > { %1247 = shalt.err (!%p1244_p3)
}
 0x1a4   : > { %s1316_s16 = smov 64   ;;  %s1317_s18 = smov 4  }
 0x1a5   : > { %1141 = dma.vmem_to_hbm [thread:$0]  (%p1392_p5), %s918_s26, 1024, %s920_s28, %s889_s29, %s1316_s16, %s1316_s16, %s1317_s18  }
 0x1a6   : > { %s1031_s19 = sshll.u32 %s1618_s13, 4  ;;  %s1071_s9 = sshll.u32 %s1375_s25, 2 }
 0x1a7   : > { %s265_s20 = scalar_lea.vmem [#allocation2], %s1031_s19  ;;  %s899_s12 = scalar_lea.hbm %s1717_s5, %s1071_s9 }
 0x1a8   : > { %s900_s14 = sshll.u32 %s265_s20, 4  ;;  %s902_s15 = sshll.u32 %s899_s12, 4  ;;  %s901_s14 = int_to_ptr.vmem [resolvable:$true] %s900_s14  ;;  %s903_s15 = int_to_ptr.hbm [resolvable:$true] %s902_s15 }
 0x1a9   : > { %s884_s26 = scalar_lea.sflag [#allocation3], %s1618_s13  ;;  %s1262_s28 = sshra.s32 %s903_s15, 4  ;;  %s1263_s28 = int_to_ptr.hbm [resolvable:$true] %s1262_s28 }
 0x1aa   : > { %s1264_s29 = scalar_lea.hbm %s1263_s28, 16  ;;  %s1268_s19 = scalar_lea.hbm %s1717_s5, 32 }
 0x1ab   : > { %p1265_p4 = scmp.ne.s32.totalorder %s1263_s28, %s1264_s29  ;;  %p1269_p9 = scmp.lt.s32.totalorder %s1263_s28, %s1717_s5 }
 0x1ac   : > { %p1270_p10 = scmp.lt.s32.totalorder %s1268_s19, %s1264_s29 }
 0x1ad   : > { %p1266_p7 = pnand %p1265_p4, %p1392_p5 }
 0x1ae   : > { %p1271_p11 = por %p1270_p10, %p1269_p9 }
 0x1af   : > { %p1267_p8 = pneg %p1266_p7 }
 0x1b1   : > { %p1272_p12 = pnand %p1271_p11, %p1267_p8 }
 0x1ce   : > { %v696_v23 = vpop.trf.xlu1 }
 0x1d6   : > { %v697_v62 = vpop.trf.xlu1 }
 0x1d7   : > { %v1080_v52 = vpack.c.bf16 %v697_v62, %v696_v23 }
 0x1d9   : > { %1081 = vst [vmem:[%s265_s20] sm:$0xff] %v1080_v52  }
 0x1de   : > { %v698_v63 = vpop.trf.xlu1 }
 0x1e6   : > { %v699_v2 = vpop.trf.xlu1 }
 0x1e7   : > { %v1085_v4 = vpack.c.bf16 %v699_v2, %v698_v63 }
 0x1e9   : > { %1127 = vst [vmem:[%s265_s20 + $0x8] sm:$0xff] %v1085_v4  }
 0x1ea   : > { %1275 = shalt.err (!%p1272_p12)
}
 0x1eb   : > { %s1318_s13 = smov 128  }
 0x1ec   : > { %1140 = dma.vmem_to_hbm [thread:$0]  (%p1392_p5), %s901_s14, 256, %s903_s15, %s884_s26, %s1316_s16, %s1318_s13, %s1317_s18  }
 0x1ed PF: > { %p1151_p13 = scmp.ge.s32.totalorder %s1314_s24, 2  ;;  %s934_s20 = sand.u32 1, %s1302_s21  }
 0x1ee   : > { %s935_s11 = scalar_lea.sflag [#allocation3], %s934_s20 }
 0x1ef   : > { %p1145_p0 = pnand %p1151_p13, %p1396_p6 }
 0x1f1   : > { %p1146_p1 = pneg %p1145_p0 }
 0x1f3   : > { %1293 = dma.done.wait (%p1146_p1), %s935_s11, 256  }
 0x1f4   : > { %1295 = vsyncadd (%p1146_p1), %s935_s11, 4294967040  ;;  %s945_s12 = scalar_lea.sflag [#allocation5], %s934_s20 }
 0x1f5   : > { %1297 = dma.done.wait (%p1146_p1), %s945_s12, 1024  }
 0x1f6   : > { %1299 = vsyncadd (%p1146_p1), %s945_s12, 4294966272  ;;  %p20_p5 = scmp.ge.s32.totalorder %s1379_s27, 4   ;;  %s1721_s21 = smov %s1306_s22 }
 0x1f7   : > { %s1722_s22 = smov %s1310_s23  ;;  %s1723_s23 = smov %s1390_s30 }
 0x1f8   : > { %s1724_s24 = smov %s1379_s27  ;;  %22 = sbr.rel (!%p20_p5) target bundleno = 5 (0x5), region = 95 }
 0x1fd   :  { %951 = vsyncpa [#allocation3], 1 }
 0x1fe   :  { %953 = vsyncpa [#allocation3 + $0x1], 1 }
 0x1ff   :  { %954 = vsyncpa [#allocation5], 1 }
 0x200   :  { %956 = vsyncpa [#allocation5 + $0x1], 1 }

</bundles_post_ra>
